<compile_context>
chip_gen: v7x
topology: tpu7x:2x2x1
jax: 0.10.0
libtpu: 0.0.40
codegen_flags: <defaults>
</compile_context>

<pallas_src>
from functools import partial

import jax
import jax.numpy as jnp
from jax.experimental import pallas as pl
from jax.experimental.pallas import tpu as pltpu


def _window_bounds(o, n_out, n_in):
    """PyTorch adaptive-pool window [start, end) for output index o (static)."""
    start = (o * n_in) // n_out
    end = -((-(o + 1) * n_in) // n_out)  # ceil((o+1)*n_in / n_out)
    return start, end


def _level_offsets(num_levels):
    """Row offsets of each pyramid level inside the consolidated output."""
    offs, off = [], 0
    for i in range(num_levels):
        offs.append(off)
        off += (2 ** i) * (2 ** i)
    return offs, off


# --------------------------------------------------------------------------
# Fast path: h, w divisible by 2**(num_levels-1).
# Input block: (b_tile, ph*pw, k_max*k_max, c)
#   axis 1 = intra-window position, axis 2 = cell index oy*k+ox, axis 3 = c.
# --------------------------------------------------------------------------
def _spp_kernel_blocked(x_ref, o_ref, *, num_levels, pool_type):
    x = x_ref[...].astype(jnp.float32)        # upcast once (f32 accumulation)
    bt, n_win, _, c = x.shape
    offs, _ = _level_offsets(num_levels)

    # Finest level: one leading-axis reduction over the whole resident block.
    if pool_type == 'max_pool':
        cur = jnp.max(x, axis=1)              # (bt, k*k, c)  -- VPU
    else:
        cur = jnp.sum(x, axis=1) * (1.0 / n_win)

    levels = [None] * num_levels
    levels[num_levels - 1] = cur

    # Coarser levels: 2x2 combine of the finer level (tiny, elementwise).
    for i in range(num_levels - 2, -1, -1):
        k2 = 2 ** i
        c4 = cur.reshape(bt, k2, 2, k2, 2, c)
        if pool_type == 'max_pool':
            cur = jnp.max(c4, axis=(2, 4))
        else:
            cur = jnp.sum(c4, axis=(2, 4)) * 0.25
        cur = cur.reshape(bt, k2 * k2, c)
        levels[i] = cur

    # One dense, lane-dense store per level into the consolidated slab.
    for i in range(num_levels):
        kk = (2 ** i) * (2 ** i)
        o_ref[:, offs[i]:offs[i] + kk, :] = levels[i].astype(o_ref.dtype)


# --------------------------------------------------------------------------
# General path (non-divisible h or w): exact adaptive-pool windows.
# Input block: (b_tile, h, w, c), channels-last.
# --------------------------------------------------------------------------
def _spp_kernel_general(x_ref, o_ref, *, num_levels, pool_type):
    x = x_ref[...].astype(jnp.float32)        # (bt, h, w, c)
    bt, h, w, c = x.shape
    offs, _ = _level_offsets(num_levels)
    for i in range(num_levels):
        k = 2 ** i
        cells = []
        for oy in range(k):
            sy, ey = _window_bounds(oy, k, h)
            for ox in range(k):
                sx, ex = _window_bounds(ox, k, w)
                win = x[:, sy:ey, sx:ex, :]   # (bt, wy, wx, c), static slice
                if pool_type == 'max_pool':
                    v = jnp.max(win, axis=(1, 2))                 # (bt, c)
                else:
                    v = jnp.sum(win, axis=(1, 2)) * (1.0 / ((ey - sy) * (ex - sx)))
                cells.append(v)
        level = jnp.stack(cells, axis=1)      # (bt, k*k, c)
        o_ref[:, offs[i]:offs[i] + k * k, :] = level.astype(o_ref.dtype)


def _pick_batch_tile(bs):
    """Largest divisor of bs <= 8, keeping >= 2 grid steps when bs >= 2."""
    if bs <= 1:
        return 1
    cap = max(1, min(8, bs // 2))
    for t in range(cap, 0, -1):
        if bs % t == 0:
            return t
    return 1


def spp_layer(x, num_levels, pool_type='max_pool'):
    """Pallas implementation of SPPLayer.forward. x: (bs, c, h, w) float."""
    bs, c, h, w = x.shape
    assert num_levels >= 1
    k_max = 2 ** (num_levels - 1)
    offs, total_cells = _level_offsets(num_levels)
    b_tile = _pick_batch_tile(bs)
    grid = (bs // b_tile,)

    x_nhwc = jnp.transpose(x, (0, 2, 3, 1))   # channels-last: c on lanes

    divisible = (h % k_max == 0) and (w % k_max == 0)
    if divisible:
        ph, pw = h // k_max, w // k_max
        # (bs, h, w, c) -> (bs, oy, iy, ox, ix, c) -> (bs, iy*ix, oy*k+ox, c)
        xk = x_nhwc.reshape(bs, k_max, ph, k_max, pw, c)
        xk = jnp.transpose(xk, (0, 2, 4, 1, 3, 5))
        xk = xk.reshape(bs, ph * pw, k_max * k_max, c)
        kernel = partial(_spp_kernel_blocked, num_levels=num_levels,
                         pool_type=pool_type)
        in_spec = pl.BlockSpec((b_tile, ph * pw, k_max * k_max, c),
                               lambda b: (b, 0, 0, 0))
        kernel_in = xk
    else:
        kernel = partial(_spp_kernel_general, num_levels=num_levels,
                         pool_type=pool_type)
        in_spec = pl.BlockSpec((b_tile, h, w, c), lambda b: (b, 0, 0, 0))
        kernel_in = x_nhwc

    pooled = pl.pallas_call(
        kernel,
        out_shape=jax.ShapeDtypeStruct((bs, total_cells, c), x.dtype),
        grid=grid,
        in_specs=[in_spec],
        out_specs=pl.BlockSpec((b_tile, total_cells, c), lambda b: (b, 0, 0)),
        compiler_params=pltpu.CompilerParams(
            dimension_semantics=("parallel",)),
    )(kernel_in)

    # Glue (plain JAX): per level, reorder (bs, k*k, c) -> torch's
    # (bs, c, k, k).view(bs, -1) flattening, then concat along last axis.
    flats = []
    for i in range(num_levels):
        kk = (2 ** i) * (2 ** i)
        lvl = pooled[:, offs[i]:offs[i] + kk, :]
        flats.append(jnp.transpose(lvl, (0, 2, 1)).reshape(bs, -1))
    return jnp.concatenate(flats, axis=-1)


def spp_reference(x, num_levels, pool_type='max_pool'):
    """Pure-JAX reference mirroring F.adaptive_{max,avg}_pool2d + view + cat."""
    bs, c, h, w = x.shape
    outs = []
    for i in range(num_levels):
        k = 2 ** i
        level = jnp.zeros((bs, c, k, k), x.dtype)
        for oy in range(k):
            sy, ey = _window_bounds(oy, k, h)
            for ox in range(k):
                sx, ex = _window_bounds(ox, k, w)
                win = x[:, :, sy:ey, sx:ex]
                if pool_type == 'max_pool':
                    v = jnp.max(win, axis=(2, 3))
                else:
                    v = jnp.mean(win, axis=(2, 3))
                level = level.at[:, :, oy, ox].set(v)
        outs.append(level.reshape(bs, -1))
    return jnp.concatenate(outs, axis=-1)


if __name__ == "__main__":
    key = jax.random.PRNGKey(0)

    tests = [
        ((2, 4, 16, 16), 4, 'max_pool'),   # fast (divisible, hierarchical) path
        ((2, 4, 16, 16), 4, 'avg_pool'),
        ((2, 4, 10, 14), 3, 'max_pool'),   # non-divisible fallback path
    ]

    for shape, num_levels, pool_type in tests:
        key, sub = jax.random.split(key)
        x = jax.random.normal(sub, shape, dtype=jnp.float32)
        out = jax.block_until_ready(spp_layer(x, num_levels, pool_type))

        bs, c = shape[0], shape[1]
        expected_width = c * sum(4 ** i for i in range(num_levels))
        assert out.shape == (bs, expected_width), (out.shape, expected_width)

        ref = spp_reference(x, num_levels, pool_type)
        assert jnp.allclose(out, ref, rtol=1e-5, atol=1e-5), \
            f"Pallas SPP mismatch vs reference for {shape}, {num_levels}, {pool_type}"

    print("KERNEL_OK")
</pallas_src>

<mosaic_0001>
module attributes {stable_mosaic.version = 11 : i64} {
  func.func @_spp_kernel_blocked(%arg0: i32, %arg1: memref<1x4x64x4xf32, #tpu.memory_space<vmem>>, %arg2: memref<1x85x4xf32, #tpu.memory_space<vmem>>) attributes {dimension_semantics = [#tpu.dimension_semantics<parallel>], iteration_bounds = array<i64: 2>, scalar_prefetch = 0 : i64, scratch_operands = 0 : i64, tpu.core_type = #tpu.core_type<tc>, window_params = [{transform_indices = @transform_0, window_bounds = array<i64: 1, 4, 64, 4>}, {transform_indices = @transform_1, window_bounds = array<i64: 1, 85, 4>}]} {
    %c0 = arith.constant 0 : index
    %c0_0 = arith.constant 0 : index
    %c0_1 = arith.constant 0 : index
    %c0_2 = arith.constant 0 : index
    %0 = vector.load %arg1[%c0, %c0_0, %c0_1, %c0_2] : memref<1x4x64x4xf32, #tpu.memory_space<vmem>>, vector<1x4x64x4xf32>
    %cst = arith.constant dense<0xFF800000> : vector<1x64x4xf32>
    %1 = vector.multi_reduction <maximumf>, %0, %cst [1] : vector<1x4x64x4xf32> to vector<1x64x4xf32>
    %2 = vector.shape_cast %1 : vector<1x64x4xf32> to vector<1x4x2x4x2x4xf32>
    %cst_3 = arith.constant dense<0xFF800000> : vector<1x4x4x4xf32>
    %3 = vector.multi_reduction <maximumf>, %2, %cst_3 [2, 4] : vector<1x4x2x4x2x4xf32> to vector<1x4x4x4xf32>
    %4 = vector.shape_cast %3 : vector<1x4x4x4xf32> to vector<1x16x4xf32>
    %5 = vector.shape_cast %4 : vector<1x16x4xf32> to vector<1x2x2x2x2x4xf32>
    %cst_4 = arith.constant dense<0xFF800000> : vector<1x2x2x4xf32>
    %6 = vector.multi_reduction <maximumf>, %5, %cst_4 [2, 4] : vector<1x2x2x2x2x4xf32> to vector<1x2x2x4xf32>
    %7 = vector.shape_cast %6 : vector<1x2x2x4xf32> to vector<1x4x4xf32>
    %8 = vector.shape_cast %7 : vector<1x4x4xf32> to vector<1x1x2x1x2x4xf32>
    %cst_5 = arith.constant dense<0xFF800000> : vector<1x1x1x4xf32>
    %9 = vector.multi_reduction <maximumf>, %8, %cst_5 [2, 4] : vector<1x1x2x1x2x4xf32> to vector<1x1x1x4xf32>
    %10 = vector.shape_cast %9 : vector<1x1x1x4xf32> to vector<1x1x4xf32>
    %c0_6 = arith.constant 0 : index
    %c0_7 = arith.constant 0 : index
    %c0_8 = arith.constant 0 : index
    %11 = vector.load %arg2[%c0_6, %c0_7, %c0_8] : memref<1x85x4xf32, #tpu.memory_space<vmem>>, vector<1x1x4xf32>
    tpu.vector_store %arg2[%c0_6, %c0_7, %c0_8], %10 {strides = array<i32>} : memref<1x85x4xf32, #tpu.memory_space<vmem>>, vector<1x1x4xf32>,
    %c0_9 = arith.constant 0 : index
    %c1 = arith.constant 1 : index
    %c0_10 = arith.constant 0 : index
    %12 = vector.load %arg2[%c0_9, %c1, %c0_10] : memref<1x85x4xf32, #tpu.memory_space<vmem>>, vector<1x4x4xf32>
    tpu.vector_store %arg2[%c0_9, %c1, %c0_10], %7 {strides = array<i32>} : memref<1x85x4xf32, #tpu.memory_space<vmem>>, vector<1x4x4xf32>,
    %c0_11 = arith.constant 0 : index
    %c5 = arith.constant 5 : index
    %c0_12 = arith.constant 0 : index
    %13 = vector.load %arg2[%c0_11, %c5, %c0_12] : memref<1x85x4xf32, #tpu.memory_space<vmem>>, vector<1x16x4xf32>
    tpu.vector_store %arg2[%c0_11, %c5, %c0_12], %4 {strides = array<i32>} : memref<1x85x4xf32, #tpu.memory_space<vmem>>, vector<1x16x4xf32>,
    %c0_13 = arith.constant 0 : index
    %c21 = arith.constant 21 : index
    %c0_14 = arith.constant 0 : index
    %14 = vector.load %arg2[%c0_13, %c21, %c0_14] : memref<1x85x4xf32, #tpu.memory_space<vmem>>, vector<1x64x4xf32>
    tpu.vector_store %arg2[%c0_13, %c21, %c0_14], %1 {strides = array<i32>} : memref<1x85x4xf32, #tpu.memory_space<vmem>>, vector<1x64x4xf32>,
    return
  }
  func.func @transform_0(%arg0: i32) -> (i32, i32, i32, i32) {
    %c0_i32 = arith.constant 0 : i32
    %c0_i32_0 = arith.constant 0 : i32
    %c0_i32_1 = arith.constant 0 : i32
    %c0_i32_2 = arith.constant 0 : i32
    return %arg0, %c0_i32, %c0_i32_0, %c0_i32_1 : i32, i32, i32, i32
  }
  func.func @transform_1(%arg0: i32) -> (i32, i32, i32) {
    %c0_i32 = arith.constant 0 : i32
    %c0_i32_0 = arith.constant 0 : i32
    %c0_i32_1 = arith.constant 0 : i32
    return %arg0, %c0_i32, %c0_i32_0 : i32, i32, i32
  }
}

</mosaic_0001>

<bundles_post_ra>
// kernel: tpu_custom_call.1
= control target key start
LH: loop header
LB: loop body
LE: loop exit
PB: predicated region body
PF: predicated region fallthrough
CT: control target
= control target key end

     0   :  { %s718_s6 = smov 0   ;;  %s1044_s0 = inlined_call_operand.vmem [shape: f32[2,4,64,4], index: 0, kind: input, shape index: {}]   ;;  %s1045_s1 = inlined_call_operand.vmem [shape: f32[2,85,4], index: 1, kind: output, shape index: {}]  }
   0x1 LB: > { %s678_s7 = sadd.s32 4294967295, %s705_s6   ;;  %p682_p0 = scmp.ge.s32.totalorder %s705_s6, 1  ;;  %s705_s6 = sphi %s718_s6, %s11_s6  }
   0x2   : > { %p87_p1 = scmp.lt.s32.totalorder %s705_s6, 3 }
   0x4   : > { %p88_p2 = pnand %p682_p0, %p87_p1 }
   0x5   : > { %p107_p3 = scmp.lt.s32.totalorder (!%p88_p2), %s678_s7, 1  ;;  %v707_v0 = vmov (!%p88_p2), 1983009808   ;;  %v218_v2 = vlaneseq (!%p88_p2)  ;;  %vm149_vm0 = vcmask (!%p88_p2), 31744   ;;  %vm382_vm1 = vcmask (!%p88_p2), 25600  }
   0x6   : > { %91 = sbr.rel (%p88_p2) target bundleno = 95 (0x5f), region = 24  ;;  %v216_v1 = vunpack.c.l.s4 (!%p88_p2), %v707_v0  ;;  %vm568_vm2 = vcmask (!%p88_p2), 1041409   ;;  %vm570_vm3 = vcmask (!%p88_p2), 1042434   ;;  %vm572_vm4 = vcmask (!%p88_p2), 1043459  }
   0x7   : > { %v219_v4 = vshrl.u32 (!%p88_p2), %v218_v2, 7  ;;  %vm596_vm5 = vcmask (!%p88_p2), 1044484   ;;  %vm598_vm6 = vcmask (!%p88_p2), 1045509   ;;  %vm575_vm7 = vcmask (!%p88_p2), 27648  }
   0x8   : > { %v217_v3 = vunpack.c.0.s8 (!%p88_p2), %v216_v1  ;;  %vm600_vm8 = vcmask (!%p88_p2), 1046534   ;;  %vm602_vm9 = vcmask (!%p88_p2), 1047559   ;;  %vm562_vm10 = vcmask (!%p88_p2), 24576  }
   0xa   : > { %v761_v26 = vsub.s32 (!%p88_p2), %v217_v3, %v219_v4 }
   0xd   : > { %s1047_s7 = smov (!%p107_p3, %s678_s7), 1 }
   0xe   : > { %s688_s8 = sshll.u32 %s1047_s7, 8  ;;  %s689_s12 = smul.u32 88, %s1047_s7 }
   0xf   : > { %s732_s11 = scalar_lea.vmem %s1044_s0, %s688_s8 }
  0x10   : > { %v117_v5 = vld [vmem:[%s732_s11] sm:$0xff]  ;;  %v118_v6 = vld [vmem:[%s732_s11 + $0x8] sm:$0xff]  ;;  %v119_v7 = vld [vmem:[%s732_s11 + $0x10] sm:$0xff]  ;;  %s791_s15 = scalar_lea.vmem %s1045_s1, %s689_s12 }
  0x11   : > { %v120_v8 = vld [vmem:[%s732_s11 + $0x18] sm:$0xff]  ;;  %v121_v9 = vld [vmem:[%s732_s11 + $0x20] sm:$0xff]  ;;  %v122_v10 = vld [vmem:[%s732_s11 + $0x28] sm:$0xff]  ;;  %v150_v11 = vsel %vm149_vm0, %v117_v5, -inf  ;;  %v157_v12 = vsel %vm149_vm0, %v118_v6, -inf  ;;  %v164_v13 = vsel %vm149_vm0, %v119_v7, -inf }
  0x12   : > { %v123_v14 = vld [vmem:[%s732_s11 + $0x30] sm:$0xff]  ;;  %v124_v15 = vld [vmem:[%s732_s11 + $0x38] sm:$0xff]  ;;  %v125_v16 = vld [vmem:[%s732_s11 + $0x40] sm:$0xff]  ;;  %v171_v17 = vsel %vm149_vm0, %v120_v8, -inf  ;;  %v178_v18 = vsel %vm149_vm0, %v121_v9, -inf  ;;  %v749_v19 = vsel %vm149_vm0, %v122_v10, -inf }
  0x13   : > { %v126_v20 = vld [vmem:[%s732_s11 + $0x48] sm:$0xff]  ;;  %v127_v21 = vld [vmem:[%s732_s11 + $0x50] sm:$0xff]  ;;  %v128_v22 = vld [vmem:[%s732_s11 + $0x58] sm:$0xff]  ;;  %v151_v23 = vsel %vm149_vm0, %v125_v16, -inf  ;;  %v756_v24 = vsel %vm149_vm0, %v123_v14, -inf  ;;  %v759_v25 = vsel %vm149_vm0, %v124_v15, -inf }
  0x14   : > { %v129_v27 = vld [vmem:[%s732_s11 + $0x60] sm:$0xff]  ;;  %v130_v28 = vld [vmem:[%s732_s11 + $0x68] sm:$0xff]  ;;  %v152_v29 = vmax.f32 %v150_v11, %v151_v23  ;;  %v158_v30 = vsel %vm149_vm0, %v126_v20, -inf  ;;  %v165_v31 = vsel %vm149_vm0, %v127_v21, -inf  ;;  %v172_v32 = vsel %vm149_vm0, %v128_v22, -inf  ;;  %v135_v39 = vld [vmem:[%s732_s11 + $0x90] sm:$0xff] }
  0x15   : > { %v133_v33 = vld [vmem:[%s732_s11 + $0x80] sm:$0xff]  ;;  %v134_v34 = vld [vmem:[%s732_s11 + $0x88] sm:$0xff]  ;;  %v159_v35 = vmax.f32 %v157_v12, %v158_v30  ;;  %v166_v36 = vmax.f32 %v164_v13, %v165_v31  ;;  %v173_v37 = vmax.f32 %v171_v17, %v172_v32  ;;  %v179_v38 = vsel %vm149_vm0, %v129_v27, -inf  ;;  %v136_v40 = vld [vmem:[%s732_s11 + $0x98] sm:$0xff] }
  0x16   : > { %v137_v41 = vld [vmem:[%s732_s11 + $0xa0] sm:$0xff]  ;;  %v153_v42 = vsel %vm149_vm0, %v133_v33, -inf  ;;  %v160_v43 = vsel %vm149_vm0, %v134_v34, -inf  ;;  %v180_v44 = vmax.f32 %v178_v18, %v179_v38  ;;  %v186_v45 = vsel %vm149_vm0, %v130_v28, -inf  ;;  %v131_v46 = vld [vmem:[%s732_s11 + $0x70] sm:$0xff]  ;;  %v138_v47 = vld [vmem:[%s732_s11 + $0xa8] sm:$0xff] }
  0x17   : > { %v139_v48 = vld [vmem:[%s732_s11 + $0xb0] sm:$0xff]  ;;  %v154_v49 = vmax.f32 %v152_v29, %v153_v42  ;;  %v161_v50 = vmax.f32 %v159_v35, %v160_v43  ;;  %v167_v51 = vsel %vm149_vm0, %v135_v39, -inf  ;;  %v174_v52 = vsel %vm149_vm0, %v136_v40, -inf  ;;  %v141_v53 = vld [vmem:[%s732_s11 + $0xc0] sm:$0xff]  ;;  %v142_v54 = vld [vmem:[%s732_s11 + $0xc8] sm:$0xff] }
  0x18   : > { %v143_v55 = vld [vmem:[%s732_s11 + $0xd0] sm:$0xff]  ;;  %v168_v56 = vmax.f32 %v166_v36, %v167_v51  ;;  %v175_v57 = vmax.f32 %v173_v37, %v174_v52  ;;  %v181_v58 = vsel %vm149_vm0, %v137_v41, -inf  ;;  %v187_v59 = vmax.f32 %v749_v19, %v186_v45  ;;  %v144_v60 = vld [vmem:[%s732_s11 + $0xd8] sm:$0xff]  ;;  %v145_v61 = vld [vmem:[%s732_s11 + $0xe0] sm:$0xff] }
  0x19   : > { %v146_v62 = vld [vmem:[%s732_s11 + $0xe8] sm:$0xff]  ;;  %v155_v63 = vsel %vm149_vm0, %v141_v53, -inf  ;;  %v162_v0 = vsel %vm149_vm0, %v142_v54, -inf  ;;  %v169_v1 = vsel %vm149_vm0, %v143_v55, -inf  ;;  %v182_v2 = vmax.f32 %v180_v44, %v181_v58  ;;  %v132_v3 = vld [vmem:[%s732_s11 + $0x78] sm:$0xff]  ;;  %v147_v5 = vld [vmem:[%s732_s11 + $0xf0] sm:$0xff] }
  0x1a   : > { %v140_v4 = vld [vmem:[%s732_s11 + $0xb8] sm:$0xff]  ;;  %v156_v6 = vmax.f32 %v154_v49, %v155_v63  ;;  %v163_v7 = vmax.f32 %v161_v50, %v162_v0  ;;  %v170_v8 = vmax.f32 %v168_v56, %v169_v1  ;;  %v176_v9 = vsel %vm149_vm0, %v144_v60, -inf }
  0x1b   : > { %v148_v10 = vld [vmem:[%s732_s11 + $0xf8] sm:$0xff]  ;;  %v177_v11 = vmax.f32 %v175_v57, %v176_v9  ;;  %v183_v12 = vsel %vm149_vm0, %v145_v61, -inf  ;;  %v188_v13 = vsel %vm149_vm0, %v138_v47, -inf  ;;  %v190_v14 = vsel %vm149_vm0, %v146_v62, -inf }
  0x1c   : > { %v184_v15 = vmax.f32 %v182_v2, %v183_v12  ;;  %v189_v16 = vmax.f32 %v187_v59, %v188_v13  ;;  %v193_v17 = vsel %vm149_vm0, %v131_v46, -inf  ;;  %v195_v18 = vsel %vm149_vm0, %v139_v48, -inf  ;;  %615 = vst.msk [vmem:[%s791_s15 + $0x15] sm:$0xff] %vm149_vm0, %v156_v6  ;;  %616 = vst.msk [vmem:[%s791_s15 + $0x1d] sm:$0xff] %vm149_vm0, %v163_v7 }
  0x1d   : > { %617 = vst.msk [vmem:[%s791_s15 + $0x25] sm:$0xff] %vm149_vm0, %v170_v8  ;;  %v194_v19 = vmax.f32 %v756_v24, %v193_v17  ;;  %v197_v20 = vsel %vm149_vm0, %v147_v5, -inf  ;;  %v200_v21 = vsel %vm149_vm0, %v132_v3, -inf  ;;  %v202_v22 = vsel %vm149_vm0, %v140_v4, -inf  ;;  %618 = vst.msk [vmem:[%s791_s15 + $0x2d] sm:$0xff] %vm149_vm0, %v177_v11 }
  0x1e   : > { %v191_v23 = vmax.f32 %v189_v16, %v190_v14  ;;  %v201_v27 = vmax.f32 %v759_v25, %v200_v21  ;;  %v204_v28 = vsel %vm149_vm0, %v148_v10, -inf  ;;  %v214_v29 = vcombine.high %v156_v6, %v156_v6  ;;  %619 = vst.msk [vmem:[%s791_s15 + $0x35] sm:$0xff] %vm149_vm0, %v184_v15 }
  0x1f   : > { %v196_v30 = vmax.f32 %v194_v19, %v195_v18  ;;  %v221_v24 = vrot.slane %v156_v6, %v761_v26  ;;  %v231_v31 = vcombine.high %v163_v7, %v163_v7  ;;  %v238_v32 = vrot.slane %v163_v7, %v761_v26 }
  0x20   : > { %v203_v33 = vmax.f32 %v201_v27, %v202_v22  ;;  %v228_v34 = vrot.slane %v214_v29, %v761_v26  ;;  %v248_v35 = vcombine.high %v170_v8, %v170_v8  ;;  %v255_v36 = vrot.slane %v170_v8, %v761_v26  ;;  %620 = vst.msk [vmem:[%s791_s15 + $0x3d] sm:$0xff] %vm149_vm0, %v191_v23 }
  0x21   : > { %v198_v25 = vmax.f32 %v196_v30, %v197_v20  ;;  %v229_v37 = vcombine.high %v221_v24, %v221_v24  ;;  %v245_v38 = vrot.slane %v231_v31, %v761_v26  ;;  %v246_v39 = vcombine.high %v238_v32, %v238_v32 }
  0x22   : > { %v205_v40 = vmax.f32 %v203_v33, %v204_v28  ;;  %v230_v41 = vcombine.high %v228_v34, %v228_v34  ;;  %v833_v42 = vrot.slane %v248_v35, %v761_v26  ;;  %v263_v43 = vcombine.high %v255_v36, %v255_v36 }
  0x23   : > { %v247_v44 = vcombine.high %v245_v38, %v245_v38  ;;  %v265_v45 = vcombine.high %v177_v11, %v177_v11  ;;  %v272_v46 = vrot.slane %v177_v11, %v761_v26  ;;  %v282_v47 = vcombine.high %v184_v15, %v184_v15  ;;  %621 = vst.msk [vmem:[%s791_s15 + $0x45] sm:$0xff] %vm149_vm0, %v198_v25 }
  0x24   : > { %v264_v48 = vcombine.high %v833_v42, %v833_v42  ;;  %v841_v49 = vrot.slane %v184_v15, %v761_v26  ;;  %v299_v50 = vcombine.high %v191_v23, %v191_v23  ;;  %v844_v51 = vrot.slane %v191_v23, %v761_v26  ;;  %622 = vst.msk [vmem:[%s791_s15 + $0x4d] sm:$0xff] %vm149_vm0, %v205_v40 }
  0x25   : > { %v849_v52 = vrot.slane %v265_v45, %v761_v26  ;;  %v280_v53 = vcombine.high %v272_v46, %v272_v46  ;;  %v852_v54 = vrot.slane %v282_v47, %v761_v26  ;;  %v316_v55 = vcombine.high %v198_v25, %v198_v25 }
  0x26   : > { %v297_v56 = vcombine.high %v841_v49, %v841_v49  ;;  %v857_v57 = vrot.slane %v299_v50, %v761_v26  ;;  %v314_v58 = vcombine.high %v844_v51, %v844_v51  ;;  %v862_v59 = vrot.slane %v198_v25, %v761_v26 }
  0x27   : > { %v281_v60 = vcombine.high %v849_v52, %v849_v52  ;;  %v298_v61 = vcombine.high %v852_v54, %v852_v54  ;;  %v869_v62 = vrot.slane %v316_v55, %v761_v26  ;;  %v333_v63 = vcombine.high %v205_v40, %v205_v40 }
  0x28   : > { %v315_v0 = vcombine.high %v857_v57, %v857_v57  ;;  %v331_v1 = vcombine.high %v862_v59, %v862_v59  ;;  %v876_v2 = vrot.slane %v205_v40, %v761_v26  ;;  %v383_v3 = vsel %vm382_vm1, %v221_v24, -inf }
  0x29   : > { %v332_v4 = vcombine.high %v869_v62, %v869_v62  ;;  %v882_v5 = vrot.slane %v333_v63, %v761_v26  ;;  %v384_v6 = vsel %vm382_vm1, %v238_v32, -inf  ;;  %v392_v7 = vsel %vm382_vm1, %v229_v37, -inf }
  0x2a   : > { %v348_v8 = vcombine.high %v876_v2, %v876_v2  ;;  %v385_v9 = vmax.f32 %v383_v3, %v384_v6  ;;  %v393_v10 = vsel %vm382_vm1, %v246_v39, -inf  ;;  %v401_v11 = vsel %vm382_vm1, %v228_v34, -inf }
  0x2b   : > { %v349_v12 = vcombine.high %v882_v5, %v882_v5  ;;  %v394_v13 = vmax.f32 %v392_v7, %v393_v10  ;;  %v402_v14 = vsel %vm382_vm1, %v245_v38, -inf  ;;  %v410_v26 = vsel %vm382_vm1, %v230_v41, -inf }
  0x2c   : > { %v386_v15 = vrot.slane %v385_v9, 4  ;;  %v403_v16 = vmax.f32 %v401_v11, %v402_v14  ;;  %v411_v17 = vsel %vm382_vm1, %v247_v44, -inf  ;;  %v419_v18 = vsel %vm382_vm1, %v255_v36, -inf }
  0x2d   : > { %v395_v19 = vrot.slane %v394_v13, 4  ;;  %v412_v20 = vmax.f32 %v410_v26, %v411_v17  ;;  %v420_v21 = vsel %vm382_vm1, %v272_v46, -inf  ;;  %v428_v22 = vsel %vm382_vm1, %v263_v43, -inf }
  0x2e   : > { %v387_v23 = vmax.f32 %v385_v9, %v386_v15  ;;  %v404_v27 = vrot.slane %v403_v16, 4  ;;  %v421_v28 = vmax.f32 %v419_v18, %v420_v21  ;;  %v429_v29 = vsel %vm382_vm1, %v280_v53, -inf }
  0x2f   : > { %v396_v30 = vmax.f32 %v394_v13, %v395_v19  ;;  %v413_v24 = vrot.slane %v412_v20, 4  ;;  %v430_v31 = vmax.f32 %v428_v22, %v429_v29  ;;  %v437_v32 = vsel %vm382_vm1, %v833_v42, -inf }
  0x30   : > { %v388_v33 = vrot.slane %v387_v23, 2  ;;  %v405_v34 = vmax.f32 %v403_v16, %v404_v27  ;;  %v422_v35 = vrot.slane %v421_v28, 4  ;;  %v438_v36 = vsel %vm382_vm1, %v849_v52, -inf }
  0x31   : > { %v397_v25 = vrot.slane %v396_v30, 2  ;;  %v414_v37 = vmax.f32 %v412_v20, %v413_v24  ;;  %v431_v38 = vrot.slane %v430_v31, 4  ;;  %v439_v39 = vmax.f32 %v437_v32, %v438_v36 }
  0x32   : > { %v389_v40 = vmax.f32 %v387_v23, %v388_v33  ;;  %v406_v41 = vrot.slane %v405_v34, 2  ;;  %v423_v43 = vmax.f32 %v421_v28, %v422_v35  ;;  %v446_v44 = vsel %vm382_vm1, %v264_v48, -inf }
  0x33   : > { %v398_v45 = vmax.f32 %v396_v30, %v397_v25  ;;  %v415_v46 = vrot.slane %v414_v37, 2  ;;  %v432_v47 = vmax.f32 %v430_v31, %v431_v38  ;;  %v440_v50 = vrot.slane %v439_v39, 4 }
  0x34   : > { %v390_v42 = vrot.slane %v389_v40, 1  ;;  %v407_v53 = vmax.f32 %v405_v34, %v406_v41  ;;  %v424_v55 = vrot.slane %v423_v43, 2  ;;  %v447_v63 = vsel %vm382_vm1, %v281_v60, -inf }
  0x35   : > { %v399_v3 = vrot.slane %v398_v45, 1  ;;  %v416_v52 = vmax.f32 %v414_v37, %v415_v46  ;;  %v433_v6 = vrot.slane %v432_v47, 2  ;;  %v441_v7 = vmax.f32 %v439_v39, %v440_v50 }
  0x36   : > { %v905_v9 = vmax.f32 %v389_v40, %v390_v42  ;;  %v408_v10 = vrot.slane %v407_v53, 1  ;;  %v425_v11 = vmax.f32 %v423_v43, %v424_v55  ;;  %v448_v13 = vmax.f32 %v446_v44, %v447_v63 }
  0x37   : > { %v907_v14 = vmax.f32 %v398_v45, %v399_v3  ;;  %v417_v48 = vrot.slane %v416_v52, 1  ;;  %v434_v26 = vmax.f32 %v432_v47, %v433_v6  ;;  %v442_v15 = vrot.slane %v441_v7, 2 }
  0x38   : > { %v909_v16 = vmax.f32 %v407_v53, %v408_v10  ;;  %v426_v17 = vrot.slane %v425_v11, 1  ;;  %v449_v18 = vrot.slane %v448_v13, 4  ;;  %v455_v60 = vsel %vm382_vm1, %v841_v49, -inf }
  0x39   : > { %v913_v19 = vmax.f32 %v416_v52, %v417_v48  ;;  %v435_v20 = vrot.slane %v434_v26, 1  ;;  %v443_v21 = vmax.f32 %v441_v7, %v442_v15  ;;  %v456_v22 = vsel %vm382_vm1, %v844_v51, -inf }
  0x3a   : > { %v917_v23 = vmax.f32 %v425_v11, %v426_v17  ;;  %v450_v27 = vmax.f32 %v448_v13, %v449_v18  ;;  %v457_v28 = vmax.f32 %v455_v60, %v456_v22  ;;  %v464_v29 = vsel %vm382_vm1, %v297_v56, -inf }
  0x3b   : > { %v923_v30 = vmax.f32 %v434_v26, %v435_v20  ;;  %v444_v24 = vrot.slane %v443_v21, 1  ;;  %v465_v31 = vsel %vm382_vm1, %v314_v58, -inf  ;;  %v473_v32 = vsel %vm382_vm1, %v852_v54, -inf }
  0x3c   : > { %v451_v33 = vrot.slane %v450_v27, 2  ;;  %v458_v34 = vrot.slane %v457_v28, 4  ;;  %v466_v35 = vmax.f32 %v464_v29, %v465_v31  ;;  %v474_v36 = vsel %vm382_vm1, %v857_v57, -inf }
  0x3d   : > { %v933_v49 = vmax.f32 %v443_v21, %v444_v24  ;;  %v475_v56 = vmax.f32 %v473_v32, %v474_v36  ;;  %v482_v25 = vsel %vm382_vm1, %v298_v61, -inf  ;;  %v483_v51 = vsel %vm382_vm1, %v315_v0, -inf }
  0x3e   : > { %v452_v58 = vmax.f32 %v450_v27, %v451_v33  ;;  %v459_v37 = vmax.f32 %v457_v28, %v458_v34  ;;  %v467_v38 = vrot.slane %v466_v35, 4  ;;  %v484_v39 = vmax.f32 %v482_v25, %v483_v51 }
  0x3f   : > { %v476_v40 = vrot.slane %v475_v56, 4  ;;  %v491_v41 = vsel %vm382_vm1, %v862_v59, -inf  ;;  %v492_v43 = vsel %vm382_vm1, %v876_v2, -inf  ;;  %v500_v54 = vsel %vm382_vm1, %v331_v1, -inf }
  0x40   : > { %v453_v61 = vrot.slane %v452_v58, 1  ;;  %v460_v57 = vrot.slane %v459_v37, 2  ;;  %v468_v44 = vmax.f32 %v466_v35, %v467_v38  ;;  %v485_v0 = vrot.slane %v484_v39, 4 }
  0x41   : > { %v477_v45 = vmax.f32 %v475_v56, %v476_v40  ;;  %v493_v46 = vmax.f32 %v491_v41, %v492_v43  ;;  %v501_v47 = vsel %vm382_vm1, %v348_v8, -inf  ;;  %v509_v50 = vsel %vm382_vm1, %v869_v62, -inf }
  0x42   : > { %v957_v42 = vmax.f32 %v452_v58, %v453_v61  ;;  %v461_v53 = vmax.f32 %v459_v37, %v460_v57  ;;  %v469_v59 = vrot.slane %v468_v44, 2  ;;  %v486_v55 = vmax.f32 %v484_v39, %v485_v0 }
  0x43   : > { %v478_v1 = vrot.slane %v477_v45, 2  ;;  %v494_v63 = vrot.slane %v493_v46, 4  ;;  %v502_v3 = vmax.f32 %v500_v54, %v501_v47  ;;  %v510_v52 = vsel %vm382_vm1, %v882_v5, -inf }
  0x44   : > { %v462_v6 = vrot.slane %v461_v53, 1  ;;  %v470_v7 = vmax.f32 %v468_v44, %v469_v59  ;;  %v487_v10 = vrot.slane %v486_v55, 2  ;;  %v511_v2 = vmax.f32 %v509_v50, %v510_v52 }
  0x45   : > { %v479_v11 = vmax.f32 %v477_v45, %v478_v1  ;;  %v495_v8 = vmax.f32 %v493_v46, %v494_v63  ;;  %v503_v13 = vrot.slane %v502_v3, 4  ;;  %v518_v48 = vsel %vm382_vm1, %v332_v4, -inf }
  0x46   : > { %v965_v26 = vmax.f32 %v461_v53, %v462_v6  ;;  %v471_v15 = vrot.slane %v470_v7, 1  ;;  %v488_v17 = vmax.f32 %v486_v55, %v487_v10  ;;  %v512_v18 = vrot.slane %v511_v2, 4 }
  0x47   : > { %v480_v60 = vrot.slane %v479_v11, 1  ;;  %v496_v20 = vrot.slane %v495_v8, 2  ;;  %v504_v21 = vmax.f32 %v502_v3, %v503_v13  ;;  %v519_v22 = vsel %vm382_vm1, %v349_v12, -inf }
  0x48   : > { %v971_v27 = vmax.f32 %v470_v7, %v471_v15  ;;  %v489_v28 = vrot.slane %v488_v17, 1  ;;  %v513_v29 = vmax.f32 %v511_v2, %v512_v18  ;;  %v520_v62 = vmax.f32 %v518_v48, %v519_v22 }
  0x49   : > { %v973_v4 = vmax.f32 %v479_v11, %v480_v60  ;;  %v497_v24 = vmax.f32 %v495_v8, %v496_v20  ;;  %v505_v31 = vrot.slane %v504_v21, 2  ;;  %v527_v32 = vsel %vm149_vm0, %v905_v9, -inf }
  0x4a   : > { %v490_v33 = vmax.f32 %v488_v17, %v489_v28  ;;  %v514_v34 = vrot.slane %v513_v29, 2  ;;  %v521_v35 = vrot.slane %v520_v62, 4  ;;  %v528_v5 = vsel %vm149_vm0, %v907_v14, -inf }
  0x4b   : > { %v498_v12 = vrot.slane %v497_v24, 1  ;;  %v506_v36 = vmax.f32 %v504_v21, %v505_v31  ;;  %v529_v56 = vmax.f32 %v527_v32, %v528_v5  ;;  %v530_v25 = vsel %vm149_vm0, %v917_v23, -inf }
  0x4c   : > { %v515_v51 = vmax.f32 %v513_v29, %v514_v34  ;;  %v522_v58 = vmax.f32 %v520_v62, %v521_v35  ;;  %v532_v37 = vsel %vm149_vm0, %v923_v30, -inf  ;;  %v534_v38 = vsel %vm149_vm0, %v909_v16, -inf }
  0x4d   : > { %v499_v39 = vmax.f32 %v497_v24, %v498_v12  ;;  %v507_v40 = vrot.slane %v506_v36, 1  ;;  %v531_v41 = vmax.f32 %v529_v56, %v530_v25  ;;  %v535_v43 = vsel %vm149_vm0, %v913_v19, -inf }
  0x4e   : > { %v516_v54 = vrot.slane %v515_v51, 1  ;;  %v523_v61 = vrot.slane %v522_v58, 2  ;;  %v536_v57 = vmax.f32 %v534_v38, %v535_v43  ;;  %v537_v44 = vsel %vm149_vm0, %v933_v49, -inf }
  0x4f   : > { %v508_v0 = vmax.f32 %v506_v36, %v507_v40  ;;  %v533_v45 = vmax.f32 %v531_v41, %v532_v37  ;;  %v539_v46 = vsel %vm149_vm0, %v957_v42, -inf  ;;  %v541_v47 = vsel %vm149_vm0, %v965_v26, -inf }
  0x50   : > { %v517_v50 = vmax.f32 %v515_v51, %v516_v54  ;;  %v524_v53 = vmax.f32 %v522_v58, %v523_v61  ;;  %v538_v59 = vmax.f32 %v536_v57, %v537_v44  ;;  %v542_v55 = vsel %vm149_vm0, %v971_v27, -inf }
  0x51   : > { %v543_v1 = vmax.f32 %v541_v47, %v542_v55  ;;  %v544_v63 = vsel %vm149_vm0, %v499_v39, -inf  ;;  %v546_v3 = vsel %vm149_vm0, %v508_v0, -inf  ;;  %v548_v52 = vsel %vm149_vm0, %v973_v4, -inf }
  0x52   : > { %v525_v6 = vrot.slane %v524_v53, 1  ;;  %v540_v7 = vmax.f32 %v538_v59, %v539_v46  ;;  %v549_v10 = vsel %vm149_vm0, %v490_v33, -inf  ;;  %v551_v2 = vsel %vm149_vm0, %v517_v50, -inf }
  0x53   : > { %v545_v11 = vmax.f32 %v543_v1, %v544_v63  ;;  %v550_v8 = vmax.f32 %v548_v52, %v549_v10  ;;  %v593_v13 = vsel %vm568_vm2, %v907_v14, %v905_v9  ;;  %v555_v15 = vsel %vm149_vm0, %v533_v45, -inf }
  0x54   : > { %v526_v48 = vmax.f32 %v524_v53, %v525_v6  ;;  %v569_v17 = vsel %vm568_vm2, %v540_v7, %v533_v45  ;;  %v594_v18 = vsel %vm570_vm3, %v909_v16, %v593_v13  ;;  %v556_v21 = vsel %vm149_vm0, %v540_v7, -inf }
  0x55   : > { %v547_v60 = vmax.f32 %v545_v11, %v546_v3  ;;  %v552_v20 = vmax.f32 %v550_v8, %v551_v2  ;;  %v595_v22 = vsel %vm572_vm4, %v913_v19, %v594_v18  ;;  %v604_v9 = vsel %vm568_vm2, %v971_v27, %v965_v26 }
  0x56   : > { %v553_v28 = vsel %vm149_vm0, %v526_v48, -inf  ;;  %v597_v14 = vsel %vm596_vm5, %v917_v23, %v595_v22  ;;  %v605_v19 = vsel %vm570_vm3, %v973_v4, %v604_v9  ;;  %v559_v24 = vmax.f32 %v555_v15, %v556_v21 }
  0x57   : > { %v554_v29 = vmax.f32 %v552_v20, %v553_v28  ;;  %v557_v16 = vsel %vm149_vm0, %v547_v60, -inf  ;;  %v571_v62 = vsel %vm570_vm3, %v547_v60, %v569_v17  ;;  %v606_v31 = vsel %vm572_vm4, %v490_v33, %v605_v19 }
  0x58   : > { %v599_v26 = vsel %vm598_vm6, %v923_v30, %v597_v14  ;;  %v607_v34 = vsel %vm596_vm5, %v499_v39, %v606_v31 }
  0x59   : > { %v558_v23 = vsel %vm149_vm0, %v554_v29, -inf  ;;  %v573_v27 = vsel %vm572_vm4, %v554_v29, %v571_v62  ;;  %v601_v32 = vsel %vm600_vm8, %v933_v49, %v599_v26  ;;  %v608_v33 = vsel %vm598_vm6, %v508_v0, %v607_v34 }
  0x5a   : > { %v560_v35 = vmax.f32 %v557_v16, %v558_v23  ;;  %576 = vst.msk [vmem:[%s791_s15 + $0x1] sm:$0xf] %vm575_vm7, %v573_v27  ;;  %v603_v4 = vsel %vm602_vm9, %v957_v42, %v601_v32  ;;  %v609_v30 = vsel %vm600_vm8, %v517_v50, %v608_v33 }
  0x5b   : > { %613 = vst.msk [vmem:[%s791_s15 + $0x5] sm:$0xff] %vm149_vm0, %v603_v4  ;;  %v610_v12 = vsel %vm602_vm9, %v526_v48, %v609_v30 }
  0x5c   : > { %v561_v5 = vmax.f32 %v559_v24, %v560_v35  ;;  %614 = vst.msk [vmem:[%s791_s15 + $0xd] sm:$0xff] %vm149_vm0, %v610_v12 }
  0x5e   : > { %563 = vst.msk [vmem:[%s791_s15] sm:$0x1] %vm562_vm10, %v561_v5 }
  0x5f PF: > { %s11_s6 = sadd.s32 1, %s705_s6  }
  0x60   : > { %p8_p4 = scmp.ge.s32.totalorder %s11_s6, 4  }
  0x62   :  { %10 = sbr.rel (!%p8_p4) target bundleno = 1 (0x1), region = 54 }

</bundles_post_ra>
